<compile_context>
chip_gen: v7x
topology: tpu7x:2x2x1
jax: 0.10.0
libtpu: 0.0.40
codegen_flags: <defaults>
</compile_context>

<pallas_src>
import functools

import jax
import jax.numpy as jnp
from jax import lax
from jax.experimental import pallas as pl
from jax.experimental.pallas import tpu as pltpu


def _round_up(x, m):
    return ((x + m - 1) // m) * m


def _pick_time_chunk(T, target=4):
    """Largest chunk <= target that divides T (keeps the grid exact)."""
    for tc in range(min(T, target), 0, -1):
        if T % tc == 0:
            return tc
    return T


def _lstm_ff_chunk_kernel(x_ref, wih_ref, whh_ref, b_ref,
                          w1_ref, b1_ref, w2_ref, b2_ref,
                          out_ref, rnn_ref, hN_ref, cN_ref,
                          pre_ref, h_sc, c_sc, *, Tc, BP, H):
    """One time-chunk of the LSTM + per-timestep FFNN forward."""
    # ---- init the cross-chunk recurrent carries on the first chunk ----
    @pl.when(pl.program_id(0) == 0)
    def _():
        h_sc[...] = jnp.zeros_like(h_sc)
        c_sc[...] = jnp.zeros_like(c_sc)

    # ---- Phase 0: hoisted non-recurrent input projection for the chunk ----
    # pre = x_chunk @ W_ih^T + (b_ih + b_hh)          -> (Tc*BP, 4H)
    pre_ref[...] = (
        jnp.dot(x_ref[...], wih_ref[...], preferred_element_type=jnp.float32)
        + b_ref[...])

    whh = whh_ref[...]                       # (H, 4H), VMEM-resident
    h = h_sc[...]                            # (BP, H) vreg-resident carries
    c = c_sc[...]

    # ---- Phase 1: the only genuinely serial part ----
    # Small static unroll over the chunk.  B is padded to BP=8 sublanes and
    # 4H == 128, so every per-step access below is a clean full tile.
    for t in range(Tc):
        r0 = t * BP
        gates = pre_ref[r0:r0 + BP, :] + jnp.dot(
            h, whh, preferred_element_type=jnp.float32)          # (BP, 4H)
        # Two fused full-vreg transcendentals instead of 4 sub-slice ones.
        sg = jax.nn.sigmoid(gates)
        tg = jnp.tanh(gates)
        i_g = sg[:, 0 * H:1 * H]
        f_g = sg[:, 1 * H:2 * H]
        g_g = tg[:, 2 * H:3 * H]
        o_g = sg[:, 3 * H:4 * H]
        c = f_g * c + i_g * g_g
        h = o_g * jnp.tanh(c)
        rnn_ref[r0:r0 + BP, :] = h           # full-sublane (8, H) store
    # TODO(synk): for long chunks replace the static unroll with
    #   lax.fori_loop(..., unroll=4-8) + pl.ds/pl.multiple_of (code size / vregs).
    # TODO(synk): latch W_hh in the MXU across the loop via
    #   pltpu.matmul_push_rhs / matmul_acc_lhs / matmul_pop instead of jnp.dot.

    # Carries for the next chunk; final-state outputs are resident blocks so
    # the value after the last grid step is what gets written back to HBM.
    h_sc[...] = h
    c_sc[...] = c
    hN_ref[...] = h
    cN_ref[...] = c

    # ---- Phase 2: batched FFNN (Linear->ReLU->Linear->ReLU) over the chunk ----
    # FFH / OUT are lane-padded to 128 in the wrapper: both stores are unmasked
    # lane-dense tiles.
    hs = rnn_ref[...]                                            # (Tc*BP, H)
    z1 = jnp.maximum(
        jnp.dot(hs, w1_ref[...], preferred_element_type=jnp.float32)
        + b1_ref[...], 0.0)
    out_ref[...] = jnp.maximum(
        jnp.dot(z1, w2_ref[...], preferred_element_type=jnp.float32)
        + b2_ref[...], 0.0)


def recurrent_ff_forward(x, params, *, time_chunk=None):
    """x: [B, T, input_size] float32 (batch_first, like the torch module)."""
    B, T, F = x.shape
    H = params["w_hh"].shape[1]              # hidden_size
    FFH = params["w1"].shape[0]              # ff hidden dim
    OUT = params["w2"].shape[0]              # ff_out_size

    BP = _round_up(max(B, 8), 8)             # batch padded to whole sublane tiles
    FP = _round_up(F, 8)                     # feature dim padded (MXU contraction)
    FFHP = _round_up(FFH, 128)               # lane-dense FFNN hidden
    OUTP = _round_up(OUT, 128)               # lane-dense FFNN output
    Tc = time_chunk if time_chunk is not None else _pick_time_chunk(T, target=4)
    assert T % Tc == 0
    n_chunks = T // Tc

    # ---- layout glue (cheap XLA side): time-major rows, sublane-padded batch,
    #      pre-transposed / zero-padded weights so the kernel does row-major
    #      x @ W with lane-dense outputs.  Zero padding is numerically exact. ----
    x_tm = jnp.transpose(x, (1, 0, 2))                            # [T, B, F]
    x_pad = jnp.pad(x_tm, ((0, 0), (0, BP - B), (0, FP - F)))     # [T, BP, FP]
    x_flat = x_pad.reshape(T * BP, FP)

    wih_t = jnp.pad(jnp.transpose(params["w_ih"]), ((0, FP - F), (0, 0)))  # [FP,4H]
    whh_t = jnp.transpose(params["w_hh"])                         # [H, 4H]
    b = (params["b_ih"] + params["b_hh"])[None, :]                # [1, 4H]
    w1p = jnp.pad(jnp.transpose(params["w1"]), ((0, 0), (0, FFHP - FFH)))  # [H,FFHP]
    b1p = jnp.pad(params["b1"], (0, FFHP - FFH))[None, :]         # [1, FFHP]
    w2p = jnp.pad(jnp.transpose(params["w2"]),
                  ((0, FFHP - FFH), (0, OUTP - OUT)))             # [FFHP, OUTP]
    b2p = jnp.pad(params["b2"], (0, OUTP - OUT))[None, :]         # [1, OUTP]
    # TODO(synk): on v6e/v7x cast the Phase-0/2 weights to bf16 (keeping
    # preferred_element_type=f32) for MXU throughput; kept f32 for exact parity.
    # TODO(synk): on v7x split BP across the two TensorCores (batch rows are
    # independent) via a leading parallel grid axis / pl.core_map.

    in_specs = [
        pl.BlockSpec((Tc * BP, FP), lambda i: (i, 0)),            # x chunk
        pl.BlockSpec((FP, 4 * H), lambda i: (0, 0)),              # W_ih^T (resident)
        pl.BlockSpec((H, 4 * H), lambda i: (0, 0)),               # W_hh^T (resident)
        pl.BlockSpec((1, 4 * H), lambda i: (0, 0)),               # bias
        pl.BlockSpec((H, FFHP), lambda i: (0, 0)),                # W1^T
        pl.BlockSpec((1, FFHP), lambda i: (0, 0)),                # b1
        pl.BlockSpec((FFHP, OUTP), lambda i: (0, 0)),             # W2^T
        pl.BlockSpec((1, OUTP), lambda i: (0, 0)),                # b2
    ]
    out_specs = (
        pl.BlockSpec((Tc * BP, OUTP), lambda i: (i, 0)),          # ff out chunk
        pl.BlockSpec((Tc * BP, H), lambda i: (i, 0)),             # rnn out chunk
        pl.BlockSpec((BP, H), lambda i: (0, 0)),                  # h_n (resident)
        pl.BlockSpec((BP, H), lambda i: (0, 0)),                  # c_n (resident)
    )

    out2d, rnn2d, h_n, c_n = pl.pallas_call(
        functools.partial(_lstm_ff_chunk_kernel, Tc=Tc, BP=BP, H=H),
        out_shape=(
            jax.ShapeDtypeStruct((T * BP, OUTP), jnp.float32),
            jax.ShapeDtypeStruct((T * BP, H), jnp.float32),
            jax.ShapeDtypeStruct((BP, H), jnp.float32),
            jax.ShapeDtypeStruct((BP, H), jnp.float32),
        ),
        grid_spec=pltpu.PrefetchScalarGridSpec(
            num_scalar_prefetch=0,
            grid=(n_chunks,),
            in_specs=in_specs,
            out_specs=out_specs,
            scratch_shapes=[
                pltpu.VMEM((Tc * BP, 4 * H), jnp.float32),        # pre-gates
                pltpu.VMEM((BP, H), jnp.float32),                 # h carry
                pltpu.VMEM((BP, H), jnp.float32),                 # c carry
            ]),
        compiler_params=pltpu.CompilerParams(
            # chunks are serially dependent through the h/c carries
            dimension_semantics=("arbitrary",),
            vmem_limit_bytes=32 * 1024 * 1024),
    )(x_flat, wih_t, whh_t, b, w1p, b1p, w2p, b2p)

    # Wrapper-side layout plumbing back to torch's batch-first shapes.
    out = jnp.transpose(out2d.reshape(T, BP, OUTP)[:, :B, :OUT], (1, 0, 2))
    rnn_out = jnp.transpose(rnn2d.reshape(T, BP, H)[:, :B, :], (1, 0, 2))
    h = (h_n[:B][None, ...], c_n[:B][None, ...])                  # ([1,B,H], [1,B,H])
    return out, rnn_out, h


def reference_forward(x, params):
    """Pure-JAX reference matching torch semantics (LSTM + per-timestep FFNN)."""
    B, T, F = x.shape
    H = params["w_hh"].shape[1]
    w_ih, w_hh = params["w_ih"], params["w_hh"]
    b_ih, b_hh = params["b_ih"], params["b_hh"]

    def step(carry, x_t):
        h, c = carry
        gates = x_t @ w_ih.T + b_ih + h @ w_hh.T + b_hh
        i = jax.nn.sigmoid(gates[:, 0 * H:1 * H])
        f = jax.nn.sigmoid(gates[:, 1 * H:2 * H])
        g = jnp.tanh(gates[:, 2 * H:3 * H])
        o = jax.nn.sigmoid(gates[:, 3 * H:4 * H])
        c = f * c + i * g
        h = o * jnp.tanh(c)
        return (h, c), h

    h0 = jnp.zeros((B, H), jnp.float32)
    c0 = jnp.zeros((B, H), jnp.float32)
    (h_n, c_n), hs = lax.scan(step, (h0, c0), jnp.transpose(x, (1, 0, 2)))
    rnn_out = jnp.transpose(hs, (1, 0, 2))
    z1 = jnp.maximum(rnn_out @ params["w1"].T + params["b1"], 0.0)
    out = jnp.maximum(z1 @ params["w2"].T + params["b2"], 0.0)
    return out, rnn_out, (h_n[None], c_n[None])


if __name__ == "__main__":
    # Module config: rnn_type="LSTM", input_size=4, hidden_size=32, num_layers=1,
    # bias=True, dropout=0.0, bidirectional=False, proj_size=0,
    # ff_out_size=4, ff_hidden_dims=(16,), ReLU activations.
    B, T, F, H, FFH, OUT = 2, 8, 4, 32, 16, 4

    key = jax.random.PRNGKey(0)
    ks = jax.random.split(key, 9)
    s = 1.0 / jnp.sqrt(H)
    params = {
        "w_ih": jax.random.uniform(ks[0], (4 * H, F), jnp.float32, -s, s),
        "w_hh": jax.random.uniform(ks[1], (4 * H, H), jnp.float32, -s, s),
        "b_ih": jax.random.uniform(ks[2], (4 * H,), jnp.float32, -s, s),
        "b_hh": jax.random.uniform(ks[3], (4 * H,), jnp.float32, -s, s),
        "w1": jax.random.uniform(ks[4], (FFH, H), jnp.float32, -s, s),
        "b1": jax.random.uniform(ks[5], (FFH,), jnp.float32, -s, s),
        "w2": jax.random.uniform(ks[6], (OUT, FFH), jnp.float32, -s, s),
        "b2": jax.random.uniform(ks[7], (OUT,), jnp.float32, -s, s),
    }
    x = jax.random.normal(ks[8], (B, T, F), jnp.float32)

    fwd = jax.jit(recurrent_ff_forward)
    out, rnn_out, (h_n, c_n) = jax.block_until_ready(fwd(x, params))

    out_r, rnn_r, (h_r, c_r) = reference_forward(x, params)
    assert out.shape == (B, T, OUT) and rnn_out.shape == (B, T, H)
    assert h_n.shape == (1, B, H) and c_n.shape == (1, B, H)
    assert jnp.allclose(out, out_r, atol=1e-5), "out mismatch"
    assert jnp.allclose(rnn_out, rnn_r, atol=1e-5), "rnn_out mismatch"
    assert jnp.allclose(h_n, h_r, atol=1e-5), "h_n mismatch"
    assert jnp.allclose(c_n, c_r, atol=1e-5), "c_n mismatch"

    # TODO(synk): padding_indicator/packed-sequence path and the autoregress()
    # loop are host-side control-flow glue around this kernel and are not
    # re-implemented here.
    print("KERNEL_OK")
</pallas_src>

<mosaic_0001>
module attributes {stable_mosaic.version = 11 : i64} {
  func.func @_lstm_ff_chunk_kernel(%arg0: i32, %arg1: memref<32x8xf32, #tpu.memory_space<vmem>>, %arg2: memref<8x128xf32, #tpu.memory_space<vmem>>, %arg3: memref<32x128xf32, #tpu.memory_space<vmem>>, %arg4: memref<1x128xf32, #tpu.memory_space<vmem>>, %arg5: memref<32x128xf32, #tpu.memory_space<vmem>>, %arg6: memref<1x128xf32, #tpu.memory_space<vmem>>, %arg7: memref<128x128xf32, #tpu.memory_space<vmem>>, %arg8: memref<1x128xf32, #tpu.memory_space<vmem>>, %arg9: memref<32x128xf32, #tpu.memory_space<vmem>>, %arg10: memref<32x32xf32, #tpu.memory_space<vmem>>, %arg11: memref<8x32xf32, #tpu.memory_space<vmem>>, %arg12: memref<8x32xf32, #tpu.memory_space<vmem>>, %arg13: memref<32x128xf32, #tpu.memory_space<vmem>>, %arg14: memref<8x32xf32, #tpu.memory_space<vmem>>, %arg15: memref<8x32xf32, #tpu.memory_space<vmem>>) attributes {dimension_semantics = [#tpu.dimension_semantics<arbitrary>], iteration_bounds = array<i64: 2>, scalar_prefetch = 0 : i64, scratch_operands = 3 : i64, tpu.core_type = #tpu.core_type<tc>, window_params = [{transform_indices = @transform_0, window_bounds = array<i64: 32, 8>}, {pipeline_mode = #tpu.pipeline_mode<synchronous>, transform_indices = @transform_1, window_bounds = array<i64: 8, 128>}, {pipeline_mode = #tpu.pipeline_mode<synchronous>, transform_indices = @transform_2, window_bounds = array<i64: 32, 128>}, {pipeline_mode = #tpu.pipeline_mode<synchronous>, transform_indices = @transform_3, window_bounds = array<i64: 1, 128>}, {pipeline_mode = #tpu.pipeline_mode<synchronous>, transform_indices = @transform_4, window_bounds = array<i64: 32, 128>}, {pipeline_mode = #tpu.pipeline_mode<synchronous>, transform_indices = @transform_5, window_bounds = array<i64: 1, 128>}, {pipeline_mode = #tpu.pipeline_mode<synchronous>, transform_indices = @transform_6, window_bounds = array<i64: 128, 128>}, {pipeline_mode = #tpu.pipeline_mode<synchronous>, transform_indices = @transform_7, window_bounds = array<i64: 1, 128>}, {transform_indices = @transform_8, window_bounds = array<i64: 32, 128>}, {transform_indices = @transform_9, window_bounds = array<i64: 32, 32>}, {pipeline_mode = #tpu.pipeline_mode<synchronous>, transform_indices = @transform_10, window_bounds = array<i64: 8, 32>}, {pipeline_mode = #tpu.pipeline_mode<synchronous>, transform_indices = @transform_11, window_bounds = array<i64: 8, 32>}]} {
    %c0_i32 = arith.constant 0 : i32
    %0 = arith.cmpi eq, %arg0, %c0_i32 : i32
    %1 = arith.extui %0 : i1 to i32
    %c0_i32_0 = arith.constant 0 : i32
    %2 = arith.cmpi ne, %1, %c0_i32_0 : i32
    scf.if %2 {
      %cst_59 = arith.constant 0.000000e+00 : f32
      %109 = vector.broadcast %cst_59 : f32 to vector<8x32xf32>
      %c0_60 = arith.constant 0 : index
      %c0_61 = arith.constant 0 : index
      %110 = vector.load %arg14[%c0_60, %c0_61] : memref<8x32xf32, #tpu.memory_space<vmem>>, vector<8x32xf32>
      tpu.vector_store %arg14[%c0_60, %c0_61], %109 {strides = array<i32>} : memref<8x32xf32, #tpu.memory_space<vmem>>, vector<8x32xf32>,
      %cst_62 = arith.constant 0.000000e+00 : f32
      %111 = vector.broadcast %cst_62 : f32 to vector<8x32xf32>
      %c0_63 = arith.constant 0 : index
      %c0_64 = arith.constant 0 : index
      %112 = vector.load %arg15[%c0_63, %c0_64] : memref<8x32xf32, #tpu.memory_space<vmem>>, vector<8x32xf32>
      tpu.vector_store %arg15[%c0_63, %c0_64], %111 {strides = array<i32>} : memref<8x32xf32, #tpu.memory_space<vmem>>, vector<8x32xf32>,
    } else {
    }
    %c0 = arith.constant 0 : index
    %c0_1 = arith.constant 0 : index
    %3 = vector.load %arg1[%c0, %c0_1] : memref<32x8xf32, #tpu.memory_space<vmem>>, vector<32x8xf32>
    %c0_2 = arith.constant 0 : index
    %c0_3 = arith.constant 0 : index
    %4 = vector.load %arg2[%c0_2, %c0_3] : memref<8x128xf32, #tpu.memory_space<vmem>>, vector<8x128xf32>
    %cst = arith.constant dense<0.000000e+00> : vector<32x128xf32>
    %5 = tpu.matmul %3, %4, %cst {dimension_numbers = #tpu.dot_dimension_numbers<[1], [0], [0], [1], [0, 0, 1, 1], [], []>} : vector<32x8xf32>, vector<8x128xf32>, vector<32x128xf32> -> vector<32x128xf32>
    %c0_4 = arith.constant 0 : index
    %c0_5 = arith.constant 0 : index
    %6 = vector.load %arg4[%c0_4, %c0_5] : memref<1x128xf32, #tpu.memory_space<vmem>>, vector<1x128xf32>
    %7 = vector.broadcast %6 : vector<1x128xf32> to vector<32x128xf32>
    %8 = arith.addf %5, %7 : vector<32x128xf32>
    %c0_6 = arith.constant 0 : index
    %c0_7 = arith.constant 0 : index
    %9 = vector.load %arg13[%c0_6, %c0_7] : memref<32x128xf32, #tpu.memory_space<vmem>>, vector<32x128xf32>
    tpu.vector_store %arg13[%c0_6, %c0_7], %8 {strides = array<i32>} : memref<32x128xf32, #tpu.memory_space<vmem>>, vector<32x128xf32>,
    %c0_8 = arith.constant 0 : index
    %c0_9 = arith.constant 0 : index
    %10 = vector.load %arg3[%c0_8, %c0_9] : memref<32x128xf32, #tpu.memory_space<vmem>>, vector<32x128xf32>
    %c0_10 = arith.constant 0 : index
    %c0_11 = arith.constant 0 : index
    %11 = vector.load %arg14[%c0_10, %c0_11] : memref<8x32xf32, #tpu.memory_space<vmem>>, vector<8x32xf32>
    %c0_12 = arith.constant 0 : index
    %c0_13 = arith.constant 0 : index
    %12 = vector.load %arg15[%c0_12, %c0_13] : memref<8x32xf32, #tpu.memory_space<vmem>>, vector<8x32xf32>
    %c0_14 = arith.constant 0 : index
    %c0_15 = arith.constant 0 : index
    %13 = vector.load %arg13[%c0_14, %c0_15] : memref<32x128xf32, #tpu.memory_space<vmem>>, vector<8x128xf32>
    %cst_16 = arith.constant dense<0.000000e+00> : vector<8x128xf32>
    %14 = tpu.matmul %11, %10, %cst_16 {dimension_numbers = #tpu.dot_dimension_numbers<[1], [0], [0], [1], [0, 0, 1, 1], [], []>} : vector<8x32xf32>, vector<32x128xf32>, vector<8x128xf32> -> vector<8x128xf32>
    %15 = arith.addf %13, %14 : vector<8x128xf32>
    %16 = arith.negf %15 : vector<8x128xf32>
    %17 = math.exp %16 : vector<8x128xf32>
    %cst_17 = arith.constant 1.000000e+00 : f32
    %18 = vector.broadcast %cst_17 : f32 to vector<8x128xf32>
    %19 = arith.addf %18, %17 : vector<8x128xf32>
    %20 = arith.divf %18, %19 : vector<8x128xf32>
    %21 = math.tanh %15 : vector<8x128xf32>
    %22 = vector.extract_strided_slice %20 {offsets = [0, 0], sizes = [8, 32], strides = [1, 1]} : vector<8x128xf32> to vector<8x32xf32>
    %23 = vector.extract_strided_slice %20 {offsets = [0, 32], sizes = [8, 32], strides = [1, 1]} : vector<8x128xf32> to vector<8x32xf32>
    %24 = vector.extract_strided_slice %21 {offsets = [0, 64], sizes = [8, 32], strides = [1, 1]} : vector<8x128xf32> to vector<8x32xf32>
    %25 = vector.extract_strided_slice %20 {offsets = [0, 96], sizes = [8, 32], strides = [1, 1]} : vector<8x128xf32> to vector<8x32xf32>
    %26 = arith.mulf %23, %12 : vector<8x32xf32>
    %27 = arith.mulf %22, %24 : vector<8x32xf32>
    %28 = arith.addf %26, %27 : vector<8x32xf32>
    %29 = math.tanh %28 : vector<8x32xf32>
    %30 = arith.mulf %25, %29 : vector<8x32xf32>
    %c0_18 = arith.constant 0 : index
    %c0_19 = arith.constant 0 : index
    %31 = vector.load %arg10[%c0_18, %c0_19] : memref<32x32xf32, #tpu.memory_space<vmem>>, vector<8x32xf32>
    tpu.vector_store %arg10[%c0_18, %c0_19], %30 {strides = array<i32>} : memref<32x32xf32, #tpu.memory_space<vmem>>, vector<8x32xf32>,
    %c8 = arith.constant 8 : index
    %c0_20 = arith.constant 0 : index
    %32 = vector.load %arg13[%c8, %c0_20] : memref<32x128xf32, #tpu.memory_space<vmem>>, vector<8x128xf32>
    %cst_21 = arith.constant dense<0.000000e+00> : vector<8x128xf32>
    %33 = tpu.matmul %30, %10, %cst_21 {dimension_numbers = #tpu.dot_dimension_numbers<[1], [0], [0], [1], [0, 0, 1, 1], [], []>} : vector<8x32xf32>, vector<32x128xf32>, vector<8x128xf32> -> vector<8x128xf32>
    %34 = arith.addf %32, %33 : vector<8x128xf32>
    %35 = arith.negf %34 : vector<8x128xf32>
    %36 = math.exp %35 : vector<8x128xf32>
    %cst_22 = arith.constant 1.000000e+00 : f32
    %37 = vector.broadcast %cst_22 : f32 to vector<8x128xf32>
    %38 = arith.addf %37, %36 : vector<8x128xf32>
    %39 = arith.divf %37, %38 : vector<8x128xf32>
    %40 = math.tanh %34 : vector<8x128xf32>
    %41 = vector.extract_strided_slice %39 {offsets = [0, 0], sizes = [8, 32], strides = [1, 1]} : vector<8x128xf32> to vector<8x32xf32>
    %42 = vector.extract_strided_slice %39 {offsets = [0, 32], sizes = [8, 32], strides = [1, 1]} : vector<8x128xf32> to vector<8x32xf32>
    %43 = vector.extract_strided_slice %40 {offsets = [0, 64], sizes = [8, 32], strides = [1, 1]} : vector<8x128xf32> to vector<8x32xf32>
    %44 = vector.extract_strided_slice %39 {offsets = [0, 96], sizes = [8, 32], strides = [1, 1]} : vector<8x128xf32> to vector<8x32xf32>
    %45 = arith.mulf %42, %28 : vector<8x32xf32>
    %46 = arith.mulf %41, %43 : vector<8x32xf32>
    %47 = arith.addf %45, %46 : vector<8x32xf32>
    %48 = math.tanh %47 : vector<8x32xf32>
    %49 = arith.mulf %44, %48 : vector<8x32xf32>
    %c8_23 = arith.constant 8 : index
    %c0_24 = arith.constant 0 : index
    %50 = vector.load %arg10[%c8_23, %c0_24] : memref<32x32xf32, #tpu.memory_space<vmem>>, vector<8x32xf32>
    tpu.vector_store %arg10[%c8_23, %c0_24], %49 {strides = array<i32>} : memref<32x32xf32, #tpu.memory_space<vmem>>, vector<8x32xf32>,
    %c16 = arith.constant 16 : index
    %c0_25 = arith.constant 0 : index
    %51 = vector.load %arg13[%c16, %c0_25] : memref<32x128xf32, #tpu.memory_space<vmem>>, vector<8x128xf32>
    %cst_26 = arith.constant dense<0.000000e+00> : vector<8x128xf32>
    %52 = tpu.matmul %49, %10, %cst_26 {dimension_numbers = #tpu.dot_dimension_numbers<[1], [0], [0], [1], [0, 0, 1, 1], [], []>} : vector<8x32xf32>, vector<32x128xf32>, vector<8x128xf32> -> vector<8x128xf32>
    %53 = arith.addf %51, %52 : vector<8x128xf32>
    %54 = arith.negf %53 : vector<8x128xf32>
    %55 = math.exp %54 : vector<8x128xf32>
    %cst_27 = arith.constant 1.000000e+00 : f32
    %56 = vector.broadcast %cst_27 : f32 to vector<8x128xf32>
    %57 = arith.addf %56, %55 : vector<8x128xf32>
    %58 = arith.divf %56, %57 : vector<8x128xf32>
    %59 = math.tanh %53 : vector<8x128xf32>
    %60 = vector.extract_strided_slice %58 {offsets = [0, 0], sizes = [8, 32], strides = [1, 1]} : vector<8x128xf32> to vector<8x32xf32>
    %61 = vector.extract_strided_slice %58 {offsets = [0, 32], sizes = [8, 32], strides = [1, 1]} : vector<8x128xf32> to vector<8x32xf32>
    %62 = vector.extract_strided_slice %59 {offsets = [0, 64], sizes = [8, 32], strides = [1, 1]} : vector<8x128xf32> to vector<8x32xf32>
    %63 = vector.extract_strided_slice %58 {offsets = [0, 96], sizes = [8, 32], strides = [1, 1]} : vector<8x128xf32> to vector<8x32xf32>
    %64 = arith.mulf %61, %47 : vector<8x32xf32>
    %65 = arith.mulf %60, %62 : vector<8x32xf32>
    %66 = arith.addf %64, %65 : vector<8x32xf32>
    %67 = math.tanh %66 : vector<8x32xf32>
    %68 = arith.mulf %63, %67 : vector<8x32xf32>
    %c16_28 = arith.constant 16 : index
    %c0_29 = arith.constant 0 : index
    %69 = vector.load %arg10[%c16_28, %c0_29] : memref<32x32xf32, #tpu.memory_space<vmem>>, vector<8x32xf32>
    tpu.vector_store %arg10[%c16_28, %c0_29], %68 {strides = array<i32>} : memref<32x32xf32, #tpu.memory_space<vmem>>, vector<8x32xf32>,
    %c24 = arith.constant 24 : index
    %c0_30 = arith.constant 0 : index
    %70 = vector.load %arg13[%c24, %c0_30] : memref<32x128xf32, #tpu.memory_space<vmem>>, vector<8x128xf32>
    %cst_31 = arith.constant dense<0.000000e+00> : vector<8x128xf32>
    %71 = tpu.matmul %68, %10, %cst_31 {dimension_numbers = #tpu.dot_dimension_numbers<[1], [0], [0], [1], [0, 0, 1, 1], [], []>} : vector<8x32xf32>, vector<32x128xf32>, vector<8x128xf32> -> vector<8x128xf32>
    %72 = arith.addf %70, %71 : vector<8x128xf32>
    %73 = arith.negf %72 : vector<8x128xf32>
    %74 = math.exp %73 : vector<8x128xf32>
    %cst_32 = arith.constant 1.000000e+00 : f32
    %75 = vector.broadcast %cst_32 : f32 to vector<8x128xf32>
    %76 = arith.addf %75, %74 : vector<8x128xf32>
    %77 = arith.divf %75, %76 : vector<8x128xf32>
    %78 = math.tanh %72 : vector<8x128xf32>
    %79 = vector.extract_strided_slice %77 {offsets = [0, 0], sizes = [8, 32], strides = [1, 1]} : vector<8x128xf32> to vector<8x32xf32>
    %80 = vector.extract_strided_slice %77 {offsets = [0, 32], sizes = [8, 32], strides = [1, 1]} : vector<8x128xf32> to vector<8x32xf32>
    %81 = vector.extract_strided_slice %78 {offsets = [0, 64], sizes = [8, 32], strides = [1, 1]} : vector<8x128xf32> to vector<8x32xf32>
    %82 = vector.extract_strided_slice %77 {offsets = [0, 96], sizes = [8, 32], strides = [1, 1]} : vector<8x128xf32> to vector<8x32xf32>
    %83 = arith.mulf %80, %66 : vector<8x32xf32>
    %84 = arith.mulf %79, %81 : vector<8x32xf32>
    %85 = arith.addf %83, %84 : vector<8x32xf32>
    %86 = math.tanh %85 : vector<8x32xf32>
    %87 = arith.mulf %82, %86 : vector<8x32xf32>
    %c24_33 = arith.constant 24 : index
    %c0_34 = arith.constant 0 : index
    %88 = vector.load %arg10[%c24_33, %c0_34] : memref<32x32xf32, #tpu.memory_space<vmem>>, vector<8x32xf32>
    tpu.vector_store %arg10[%c24_33, %c0_34], %87 {strides = array<i32>} : memref<32x32xf32, #tpu.memory_space<vmem>>, vector<8x32xf32>,
    %c0_35 = arith.constant 0 : index
    %c0_36 = arith.constant 0 : index
    %89 = vector.load %arg14[%c0_35, %c0_36] : memref<8x32xf32, #tpu.memory_space<vmem>>, vector<8x32xf32>
    tpu.vector_store %arg14[%c0_35, %c0_36], %87 {strides = array<i32>} : memref<8x32xf32, #tpu.memory_space<vmem>>, vector<8x32xf32>,
    %c0_37 = arith.constant 0 : index
    %c0_38 = arith.constant 0 : index
    %90 = vector.load %arg15[%c0_37, %c0_38] : memref<8x32xf32, #tpu.memory_space<vmem>>, vector<8x32xf32>
    tpu.vector_store %arg15[%c0_37, %c0_38], %85 {strides = array<i32>} : memref<8x32xf32, #tpu.memory_space<vmem>>, vector<8x32xf32>,
    %c0_39 = arith.constant 0 : index
    %c0_40 = arith.constant 0 : index
    %91 = vector.load %arg11[%c0_39, %c0_40] : memref<8x32xf32, #tpu.memory_space<vmem>>, vector<8x32xf32>
    tpu.vector_store %arg11[%c0_39, %c0_40], %87 {strides = array<i32>} : memref<8x32xf32, #tpu.memory_space<vmem>>, vector<8x32xf32>,
    %c0_41 = arith.constant 0 : index
    %c0_42 = arith.constant 0 : index
    %92 = vector.load %arg12[%c0_41, %c0_42] : memref<8x32xf32, #tpu.memory_space<vmem>>, vector<8x32xf32>
    tpu.vector_store %arg12[%c0_41, %c0_42], %85 {strides = array<i32>} : memref<8x32xf32, #tpu.memory_space<vmem>>, vector<8x32xf32>,
    %c0_43 = arith.constant 0 : index
    %c0_44 = arith.constant 0 : index
    %93 = vector.load %arg10[%c0_43, %c0_44] : memref<32x32xf32, #tpu.memory_space<vmem>>, vector<32x32xf32>
    %c0_45 = arith.constant 0 : index
    %c0_46 = arith.constant 0 : index
    %94 = vector.load %arg5[%c0_45, %c0_46] : memref<32x128xf32, #tpu.memory_space<vmem>>, vector<32x128xf32>
    %cst_47 = arith.constant dense<0.000000e+00> : vector<32x128xf32>
    %95 = tpu.matmul %93, %94, %cst_47 {dimension_numbers = #tpu.dot_dimension_numbers<[1], [0], [0], [1], [0, 0, 1, 1], [], []>} : vector<32x32xf32>, vector<32x128xf32>, vector<32x128xf32> -> vector<32x128xf32>
    %c0_48 = arith.constant 0 : index
    %c0_49 = arith.constant 0 : index
    %96 = vector.load %arg6[%c0_48, %c0_49] : memref<1x128xf32, #tpu.memory_space<vmem>>, vector<1x128xf32>
    %97 = vector.broadcast %96 : vector<1x128xf32> to vector<32x128xf32>
    %98 = arith.addf %95, %97 : vector<32x128xf32>
    %cst_50 = arith.constant 0.000000e+00 : f32
    %99 = vector.broadcast %cst_50 : f32 to vector<32x128xf32>
    %100 = arith.maximumf %98, %99 : vector<32x128xf32>
    %c0_51 = arith.constant 0 : index
    %c0_52 = arith.constant 0 : index
    %101 = vector.load %arg7[%c0_51, %c0_52] : memref<128x128xf32, #tpu.memory_space<vmem>>, vector<128x128xf32>
    %cst_53 = arith.constant dense<0.000000e+00> : vector<32x128xf32>
    %102 = tpu.matmul %100, %101, %cst_53 {dimension_numbers = #tpu.dot_dimension_numbers<[1], [0], [0], [1], [0, 0, 1, 1], [], []>} : vector<32x128xf32>, vector<128x128xf32>, vector<32x128xf32> -> vector<32x128xf32>
    %c0_54 = arith.constant 0 : index
    %c0_55 = arith.constant 0 : index
    %103 = vector.load %arg8[%c0_54, %c0_55] : memref<1x128xf32, #tpu.memory_space<vmem>>, vector<1x128xf32>
    %104 = vector.broadcast %103 : vector<1x128xf32> to vector<32x128xf32>
    %105 = arith.addf %102, %104 : vector<32x128xf32>
    %cst_56 = arith.constant 0.000000e+00 : f32
    %106 = vector.broadcast %cst_56 : f32 to vector<32x128xf32>
    %107 = arith.maximumf %105, %106 : vector<32x128xf32>
    %c0_57 = arith.constant 0 : index
    %c0_58 = arith.constant 0 : index
    %108 = vector.load %arg9[%c0_57, %c0_58] : memref<32x128xf32, #tpu.memory_space<vmem>>, vector<32x128xf32>
    tpu.vector_store %arg9[%c0_57, %c0_58], %107 {strides = array<i32>} : memref<32x128xf32, #tpu.memory_space<vmem>>, vector<32x128xf32>,
    return
  }
  func.func @transform_0(%arg0: i32) -> (i32, i32) {
    %c0_i32 = arith.constant 0 : i32
    %c0_i32_0 = arith.constant 0 : i32
    return %arg0, %c0_i32 : i32, i32
  }
  func.func @transform_1(%arg0: i32) -> (i32, i32) {
    %c0_i32 = arith.constant 0 : i32
    %c0_i32_0 = arith.constant 0 : i32
    %c0_i32_1 = arith.constant 0 : i32
    return %c0_i32, %c0_i32_0 : i32, i32
  }
  func.func @transform_2(%arg0: i32) -> (i32, i32) {
    %c0_i32 = arith.constant 0 : i32
    %c0_i32_0 = arith.constant 0 : i32
    %c0_i32_1 = arith.constant 0 : i32
    return %c0_i32, %c0_i32_0 : i32, i32
  }
  func.func @transform_3(%arg0: i32) -> (i32, i32) {
    %c0_i32 = arith.constant 0 : i32
    %c0_i32_0 = arith.constant 0 : i32
    %c0_i32_1 = arith.constant 0 : i32
    return %c0_i32, %c0_i32_0 : i32, i32
  }
  func.func @transform_4(%arg0: i32) -> (i32, i32) {
    %c0_i32 = arith.constant 0 : i32
    %c0_i32_0 = arith.constant 0 : i32
    %c0_i32_1 = arith.constant 0 : i32
    return %c0_i32, %c0_i32_0 : i32, i32
  }
  func.func @transform_5(%arg0: i32) -> (i32, i32) {
    %c0_i32 = arith.constant 0 : i32
    %c0_i32_0 = arith.constant 0 : i32
    %c0_i32_1 = arith.constant 0 : i32
    return %c0_i32, %c0_i32_0 : i32, i32
  }
  func.func @transform_6(%arg0: i32) -> (i32, i32) {
    %c0_i32 = arith.constant 0 : i32
    %c0_i32_0 = arith.constant 0 : i32
    %c0_i32_1 = arith.constant 0 : i32
    return %c0_i32, %c0_i32_0 : i32, i32
  }
  func.func @transform_7(%arg0: i32) -> (i32, i32) {
    %c0_i32 = arith.constant 0 : i32
    %c0_i32_0 = arith.constant 0 : i32
    %c0_i32_1 = arith.constant 0 : i32
    return %c0_i32, %c0_i32_0 : i32, i32
  }
  func.func @transform_8(%arg0: i32) -> (i32, i32) {
    %c0_i32 = arith.constant 0 : i32
    %c0_i32_0 = arith.constant 0 : i32
    return %arg0, %c0_i32 : i32, i32
  }
  func.func @transform_9(%arg0: i32) -> (i32, i32) {
    %c0_i32 = arith.constant 0 : i32
    %c0_i32_0 = arith.constant 0 : i32
    return %arg0, %c0_i32 : i32, i32
  }
  func.func @transform_10(%arg0: i32) -> (i32, i32) {
    %c0_i32 = arith.constant 0 : i32
    %c0_i32_0 = arith.constant 0 : i32
    %c0_i32_1 = arith.constant 0 : i32
    return %c0_i32, %c0_i32_0 : i32, i32
  }
  func.func @transform_11(%arg0: i32) -> (i32, i32) {
    %c0_i32 = arith.constant 0 : i32
    %c0_i32_0 = arith.constant 0 : i32
    %c0_i32_1 = arith.constant 0 : i32
    return %c0_i32, %c0_i32_0 : i32, i32
  }
}

</mosaic_0001>

<bundles_post_ra>
// kernel: recurrent_ff_forward.1
= control target key start
LH: loop header
LB: loop body
LE: loop exit
PB: predicated region body
PF: predicated region fallthrough
CT: control target
= control target key end

     0   :  { %s1661_s17 = smov 0   ;;  %s1854_s0 = inlined_call_operand.vmem [shape: f32[64,8], index: 0, kind: input, shape index: {}]   ;;  %s1855_s1 = inlined_call_operand.vmem [shape: f32[8,128], index: 1, kind: input, shape index: {}]   ;;  %s1856_s2 = inlined_call_operand.vmem [shape: f32[32,128], index: 2, kind: input, shape index: {}]   ;;  %s1857_s3 = inlined_call_operand.vmem [shape: f32[1,128], index: 3, kind: input, shape index: {}]   ;;  %s1858_s4 = inlined_call_operand.vmem [shape: f32[32,128], index: 4, kind: input, shape index: {}]   ;;  %s1859_s5 = inlined_call_operand.vmem [shape: f32[1,128], index: 5, kind: input, shape index: {}]   ;;  %s1860_s6 = inlined_call_operand.vmem [shape: f32[128,128], index: 6, kind: input, shape index: {}]   ;;  %s1861_s7 = inlined_call_operand.vmem [shape: f32[1,128], index: 7, kind: input, shape index: {}]   ;;  %s1862_s8 = inlined_call_operand.vmem [shape: f32[64,128], index: 8, kind: output, shape index: {0}]   ;;  %s1863_s9 = inlined_call_operand.vmem [shape: f32[64,32], index: 9, kind: output, shape index: {1}]   ;;  %s1864_s10 = inlined_call_operand.vmem [shape: f32[8,32], index: 10, kind: output, shape index: {2}]   ;;  %s1865_s11 = inlined_call_operand.vmem [shape: f32[8,32], index: 11, kind: output, shape index: {3}]  }
   0x1 LB: > { %s1285_s18 = sadd.s32 4294967295, %s1592_s17   ;;  %p1289_p0 = scmp.ge.s32.totalorder %s1592_s17, 1  ;;  %s1592_s17 = sphi %s1661_s17, %s22_s17  }
   0x2   : > { %p335_p1 = scmp.lt.s32.totalorder %s1592_s17, 3 }
   0x4   : > { %p336_p2 = pnand %p1289_p0, %p335_p1 }
   0x5   : > { %s1290_s19 = sshll.u32 (!%p336_p2), %s1285_s18, 2  ;;  %p1296_p4 = scmp.ne.s32.totalorder (!%p336_p2), %s1285_s18, 0 }
   0x6   : > { %339 = sbr.rel (%p336_p2) target bundleno = 3284 (0xcd4), region = 52  ;;  %p381_p3 = scmp.lt.s32.totalorder (!%p336_p2), %s1290_s19, 7 }
   0xd   : > { %s1867_s19 = smov (!%p381_p3, %s1290_s19), 7  ;;  %401 = sbr.rel (%p1296_p4) target bundleno = 20 (0x14), region = 56 }
   0xe   : > { %s1291_s20 = sshll.u32 %s1867_s19, 3  ;;  %vm402_vm0 = vcmask (!%p1296_p4), 261120   ;;  %v1594_v0 = vmov (!%p1296_p4), 0.0  }
   0xf   : > { %s384_s23 = scalar_lea.vmem %s1854_s0, %s1291_s20  ;;  %s1675_s26 = scalar_lea.vmem %s1862_s8, %s1291_s20  ;;  %403 = vst.msk [vmem:[#allocation3] sm:$0xff] (!%p1296_p4), %vm402_vm0, %v1594_v0  ;;  %404 = vst.msk [vmem:[#allocation4] sm:$0xff] (!%p1296_p4), %vm402_vm0, %v1594_v0 }
  0x10   : > { %s1680_s29 = scalar_lea.vmem %s1863_s9, %s1291_s20 }
  0x14 PF: > { %v409_v1 = vld [vmem:[%s1855_s1] sm:$0xff]  ;;  %vm417_vm1 = vcmask 64512   ;;  %v406_v3 = vld [vmem:[%s384_s23 + $0x8] sm:$0xff]  ;;  %v407_v6 = vld [vmem:[%s384_s23 + $0x10] sm:$0xff]  ;;  %v1595_v10 = vmov 0.0|0.0   ;;  %vm1596_vm2 = vmmov 0  }
  0x15   : > { %v405_v2 = vld [vmem:[%s384_s23] sm:$0xff]  ;;  %1371 = vmatprep.subr.mxu1 %v409_v1  ;;  %v520_v5 = vld [vmem:[%s1856_s2 + $0x8] sm:$0xff]  ;;  %v521_v8 = vld [vmem:[%s1856_s2 + $0x10] sm:$0xff]  ;;  %1493 = vmatprep.subr.bf16.mxu0 %v1595_v10  ;;  %v1597_v13 = vmov 0.0   ;;  %vm526_vm3 = vcmask 261120   ;;  %s1598_s24 = smov 64  }
  0x16   : > { %1373 = vmatprep.mubr.msk.f32.mxu1 %vm417_vm1, %v405_v2  ;;  %v519_v4 = vld [vmem:[%s1856_s2] sm:$0xff]  ;;  %1372 = vmatpush3.msra.mxu1 %v409_v1  ;;  %v522_v9 = vld [vmem:[%s1856_s2 + $0x18] sm:$0xff]  ;;  %v524_v28 = vld [vmem:[#allocation4] sm:$0xff]  ;;  %s1599_s25 = smov 32   ;;  %s1600_s27 = smov 96  }
  0x17   : > { %v1692_v7 = vpack.c.bf16 %v520_v5, %v519_v4  ;;  %1374 = vmatmul.mubr.msk.f32.vlgmr.msra.gmra.mrb[0].mxu1 %vm417_vm1, %v406_v3  ;;  %1475 = vmatprep.subr.bf16.mxu1 %v1595_v10  ;;  %v408_v11 = vld [vmem:[%s384_s23 + $0x18] sm:$0xff]  ;;  %v1705_v12 = vpack.c.bf16 %v522_v9, %v521_v8  ;;  %v523_v14 = vld [vmem:[#allocation3] sm:$0xff] }
  0x18   : > { %1376 = vmatprep.mubr.msk.f32.mxu1 %vm417_vm1, %v407_v6  ;;  %1420 = vmatprep.mubr.msk.f32.mxu0 %vm1596_vm2, %v1597_v13  ;;  %v1297_v15 = vld [vmem:[%s1857_s3] ss:$0 sm:$0xff] }
  0x19   : > { %1477 = vmatpush3.bf16.msra.mxu1 %v1692_v7  ;;  %1495 = vmatpush3.bf16.msra.mxu0 %v1692_v7 }
  0x1a   : > { %1478 = vmatprep.subr.bf16.mxu1 %v1595_v10  ;;  %1496 = vmatprep.subr.bf16.mxu0 %v1595_v10 }
  0x1b   : > { %1377 = vmatmul.mubr.msk.f32.gmra.mrb[2].mxu1 %vm417_vm1, %v408_v11 }
  0x1c   : > { %1387 = vmatprep.mubr.msk.f32.mxu1 %vm1596_vm2, %v1597_v13 }
  0x1d   : > { %1480 = vmatpush3.bf16.msra.mxu1 %v1705_v12  ;;  %1498 = vmatpush3.bf16.msra.mxu0 %v1705_v12 }
  0x1e   : > { %1481 = vmatprep.subr.bf16.mxu1 %v1595_v10 }
  0x20   : > { %1388 = vmatmul.mubr.msk.f32.vlgmr.msra.gmra.mrb[4].mxu1 %vm526_vm3, %v523_v14 }
  0x21   : > { %1483 = vmatpush3.bf16.msra.mxu1 %v1692_v7  ;;  %1398 = vmatprep.mubr.msk.f32.mxu1 %vm1596_vm2, %v1597_v13 }
  0x22   : > { %1484 = vmatprep.subr.bf16.mxu1 %v1595_v10 }
  0x25   : > { %1486 = vmatpush3.bf16.msra.mxu1 %v1705_v12 }
  0x26   : > { %1487 = vmatprep.subr.bf16.mxu1 %v1595_v10 }
  0xea   : > { %v1375_v16 = vpop.f32.mrb[0].mxu1 }
  0xeb   : > { %v502_v17 = vadd.f32 %v1375_v16, %v1297_v15  ;;  %v496_v18 = vpop.f32.mrb[1].mxu1 }
  0xec   : > { %v497_v23 = vadd.f32 %v1297_v15, %v496_v18 }
  0xee   : > { %v1378_v19 = vpop.f32.mrb[2].mxu1 }
  0xef   : > { %v1725_v20 = vadd.f32 %v1378_v19, %v1297_v15  ;;  %v506_v21 = vpop.f32.mrb[3].mxu1 }
  0xf0   : > { %v1727_v22 = vadd.f32 %v1297_v15, %v506_v21 }
  0xf3   : > { %v596_v24 = vpop.f32.mrb[4].mxu1 }
  0xf4   : > { %v600_v25 = vadd.f32 %v596_v24, %v497_v23  ;;  %v1389_v26 = vpop.f32.mrb[5].mxu1 }
  0xf6   : > { %1554 = vtanh.f32 %v600_v25  ;;  %v1303_v29 = vmul.f32 -1.442695, %v600_v25 }
  0xf8   : > { %1556 = vpow2.f32 %v1303_v29 }
 0x100   : > { %v1555_v27 = vpop.eup %1554 }
 0x101   : > { %614 = vrot.lane.b32.xlu0 %v1555_v27, %s1598_s24  ;;  %v955_v27 = vld [vmem:[%s1858_s4] sm:$0xff] }
 0x102   : > { %v1557_v30 = vpop.eup %1556 }
 0x103   : > { %v604_v31 = vadd.f32 1.0, %v1557_v30  ;;  %v957_v30 = vld [vmem:[%s1858_s4 + $0x10] sm:$0xff] }
 0x105   : > { %609 = vrot.lane.b32.xlu0 %v524_v28, %s1599_s25  ;;  %1558 = vrcp.f32 %v604_v31  ;;  %v956_v28 = vld [vmem:[%s1858_s4 + $0x8] sm:$0xff]  ;;  %v958_v31 = vld [vmem:[%s1858_s4 + $0x18] sm:$0xff] }
 0x106   : > { %v1499_v29 = vpack.c.bf16 %v956_v28, %v955_v27 }
 0x10f   : > { %v1559_v32 = vpop.eup %1558 }
 0x173   : > { %v615_v33 = vpop.permute.xlu0 %614 }
 0x174   : > { %v617_v34 = vmul.f32 %v1559_v32, %v615_v33 }
 0x176   : > { %619 = vrot.lane.b32.xlu1 %v617_v34, %s1599_s25 }
 0x177   : > { %v610_v35 = vpop.permute.xlu0 %609 }
 0x178   : > { %v612_v36 = vmul.f32 %v1559_v32, %v610_v35  ;;  %v1067_v35 = vld [vmem:[%s1860_s6] sm:$0xff] }
 0x1e8   : > { %v620_v37 = vpop.permute.xlu1 %619 }
 0x1e9   : > { %v622_v38 = vadd.f32 %v620_v37, %v612_v36  ;;  %v1068_v36 = vld [vmem:[%s1860_s6 + $0x8] sm:$0xff]  ;;  %v1069_v37 = vld [vmem:[%s1860_s6 + $0x10] sm:$0xff] }
 0x1eb   : > { %1560 = vtanh.f32 %v622_v38 }
 0x1f5   : > { %v1561_v39 = vpop.eup %1560 }
 0x1f6   : > { %625 = vrot.lane.b32.xlu1 %v1561_v39, %s1598_s24  ;;  %v1507_v39 = vpack.c.bf16 %v1068_v36, %v1067_v35 }
 0x1f8   : > { %1508 = vmatprep.subr.bf16.mxu0 %v1507_v39 }
 0x268   : > { %v626_v40 = vpop.permute.xlu1 %625 }
 0x269   : > { %v628_v41 = vmul.f32 %v1559_v32, %v626_v40  ;;  %v1503_v32 = vpack.c.bf16 %v958_v31, %v957_v30  ;;  %v1070_v40 = vld [vmem:[%s1860_s6 + $0x18] sm:$0xff] }
 0x26b   : > { %630 = vrot.lane.b32.xlu0 %v628_v41, %s1599_s25  ;;  %v1511_v41 = vpack.c.bf16 %v1070_v40, %v1069_v37 }
 0x2dd   : > { %v631_v42 = vpop.permute.xlu0 %630 }
 0x2de   : > { %633 = vst.msk [vmem:[%s1680_s29] sm:$0xff] %vm526_vm3, %v631_v42  ;;  %1399 = vmatmul.mubr.msk.f32.vlgmr.msra.gmra.mrb[6].mxu1 %vm526_vm3, %v631_v42  ;;  %v1071_v42 = vld [vmem:[%s1860_s6 + $0x20] sm:$0xff] }
 0x2df   : > { %1489 = vmatpush3.bf16.msra.mxu1 %v1692_v7  ;;  %1409 = vmatprep.mubr.msk.f32.mxu1 %vm1596_vm2, %v1597_v13 }
 0x2e0   : > { %1490 = vmatprep.subr.bf16.mxu1 %v1595_v10 }
 0x2e3   : > { %1492 = vmatpush3.bf16.msra.mxu1 %v1705_v12 }
 0x2e4   : > { %1500 = vmatprep.subr.bf16.mxu1 %v1499_v29 }
 0x3b1   : > { %v703_v43 = vpop.f32.mrb[6].mxu1 }
 0x3b2   : > { %v707_v44 = vadd.f32 %v703_v43, %v502_v17  ;;  %v1400_v45 = vpop.f32.mrb[7].mxu1  ;;  %v1072_v43 = vld [vmem:[%s1860_s6 + $0x28] sm:$0xff] }
 0x3b3   : > { %v1073_v45 = vld [vmem:[%s1860_s6 + $0x30] sm:$0xff] }
 0x3b4   : > { %1562 = vtanh.f32 %v707_v44  ;;  %v1305_v47 = vmul.f32 -1.442695, %v707_v44  ;;  %v1515_v44 = vpack.c.bf16 %v1072_v43, %v1071_v42 }
 0x3b6   : > { %1564 = vpow2.f32 %v1305_v47 }
 0x3be   : > { %v1563_v46 = vpop.eup %1562 }
 0x3bf   : > { %717 = vrot.lane.b32.xlu1 %v1563_v46, %s1598_s24  ;;  %v1074_v46 = vld [vmem:[%s1860_s6 + $0x38] sm:$0xff] }
 0x3c0   : > { %v1565_v48 = vpop.eup %1564  ;;  %v1519_v47 = vpack.c.bf16 %v1074_v46, %v1073_v45 }
 0x3c1   : > { %v711_v49 = vadd.f32 1.0, %v1565_v48  ;;  %v1075_v48 = vld [vmem:[%s1860_s6 + $0x40] sm:$0xff] }
 0x3c3   : > { %1566 = vrcp.f32 %v711_v49  ;;  %v1076_v49 = vld [vmem:[%s1860_s6 + $0x48] sm:$0xff] }
 0x3cd   : > { %v1567_v50 = vpop.eup %1566 }
 0x3ce   : > { %v715_v53 = vmul.f32 %v1567_v50, %v622_v38 }
 0x431   : > { %v718_v51 = vpop.permute.xlu1 %717 }
 0x432   : > { %v720_v52 = vmul.f32 %v1567_v50, %v718_v51  ;;  %v1077_v51 = vld [vmem:[%s1860_s6 + $0x50] sm:$0xff] }
 0x434   : > { %722 = vrot.lane.b32.xlu0 %v720_v52, %s1599_s25  ;;  %v1078_v52 = vld [vmem:[%s1860_s6 + $0x58] sm:$0xff] }
 0x4a6   : > { %v723_v54 = vpop.permute.xlu0 %722 }
 0x4a7   : > { %v725_v55 = vadd.f32 %v723_v54, %v715_v53  ;;  %v1527_v53 = vpack.c.bf16 %v1078_v52, %v1077_v51  ;;  %v1079_v54 = vld [vmem:[%s1860_s6 + $0x60] sm:$0xff] }
 0x4a9   : > { %1568 = vtanh.f32 %v725_v55 }
 0x4b3   : > { %v1569_v56 = vpop.eup %1568 }
 0x4b4   : > { %728 = vrot.lane.b32.xlu1 %v1569_v56, %s1598_s24 }
 0x526   : > { %v729_v57 = vpop.permute.xlu1 %728 }
 0x527   : > { %v731_v58 = vmul.f32 %v1567_v50, %v729_v57  ;;  %v1523_v50 = vpack.c.bf16 %v1076_v49, %v1075_v48 }
 0x529   : > { %733 = vrot.lane.b32.xlu0 %v731_v58, %s1599_s25  ;;  %v951_v58 = vld [vmem:[%s1680_s29] sm:$0xff] }
 0x59b   : > { %v734_v59 = vpop.permute.xlu0 %733 }
 0x59c   : > { %736 = vst.msk [vmem:[%s1680_s29 + $0x8] sm:$0xff] %vm526_vm3, %v734_v59  ;;  %1410 = vmatmul.mubr.msk.f32.vlgmr.msra.gmra.mrb[8].mxu1 %vm526_vm3, %v734_v59 }
 0x59d   : > { %1502 = vmatpush3.bf16.msra.mxu1 %v1499_v29  ;;  %1431 = vmatprep.mubr.msk.f32.mxu1 %vm526_vm3, %v951_v58 }
 0x59e   : > { %1504 = vmatprep.subr.bf16.mxu1 %v1503_v32 }
 0x5a1   : > { %1506 = vmatpush3.bf16.msra.mxu1 %v1503_v32 }
 0x5a3   : > { %v952_v59 = vld [vmem:[%s1680_s29 + $0x8] sm:$0xff] }
 0x5a4   : > { %1432 = vmatmul.mubr.msk.f32.vlgmr.msra.gmra.mrb[10].mxu1 %vm526_vm3, %v952_v59 }
 0x66f   : > { %v806_v60 = vpop.f32.mrb[8].mxu1 }
 0x670   : > { %v810_v61 = vadd.f32 %v806_v60, %v1727_v22  ;;  %v1411_v62 = vpop.f32.mrb[9].mxu1 }
 0x671   : > { %v1081_v62 = vld [vmem:[%s1860_s6 + $0x70] sm:$0xff] }
 0x672   : > { %1570 = vtanh.f32 %v810_v61  ;;  %v1307_v0 = vmul.f32 -1.442695, %v810_v61 }
 0x674   : > { %1572 = vpow2.f32 %v1307_v0 }
 0x67c   : > { %v1571_v63 = vpop.eup %1570 }
 0x67d   : > { %820 = vrot.lane.b32.xlu1 %v1571_v63, %s1598_s24  ;;  %v1082_v63 = vld [vmem:[%s1860_s6 + $0x78] sm:$0xff] }
 0x67e   : > { %v1573_v1 = vpop.eup %1572  ;;  %v1535_v0 = vpack.c.bf16 %v1082_v63, %v1081_v62 }
 0x67f   : > { %v814_v2 = vadd.f32 1.0, %v1573_v1  ;;  %v1310_v1 = vld [vmem:[%s1859_s5] ss:$0 sm:$0xff] }
 0x681   : > { %1574 = vrcp.f32 %v814_v2  ;;  %v1433_v2 = vpop.f32.mrb[10].mxu1 }
 0x68b   : > { %v1575_v3 = vpop.eup %1574 }
 0x68c   : > { %v818_v6 = vmul.f32 %v1575_v3, %v725_v55  ;;  %v1080_v55 = vld [vmem:[%s1860_s6 + $0x68] sm:$0xff] }
 0x68d   : > { %v1531_v56 = vpack.c.bf16 %v1080_v55, %v1079_v54 }
 0x6ef   : > { %v821_v4 = vpop.permute.xlu1 %820 }
 0x6f0   : > { %v823_v5 = vmul.f32 %v1575_v3, %v821_v4  ;;  %v1044_v4 = vpop.f32.mrb[11].mxu1 }
 0x6f2   : > { %825 = vrot.lane.b32.xlu0 %v823_v5, %s1599_s25  ;;  %v1045_v5 = vadd.f32 %v1310_v1, %v1044_v4 }
 0x764   : > { %v826_v7 = vpop.permute.xlu0 %825 }
 0x765   : > { %v828_v8 = vadd.f32 %v826_v7, %v818_v6  ;;  %v1063_v6 = vmax.f32 %v1045_v5, 0.0 }
 0x767   : > { %1576 = vtanh.f32 %v828_v8 }
 0x771   : > { %v1577_v9 = vpop.eup %1576 }
 0x772   : > { %831 = vrot.lane.b32.xlu1 %v1577_v9, %s1598_s24 }
 0x7e4   : > { %v832_v10 = vpop.permute.xlu1 %831 }
 0x7e5   : > { %v834_v11 = vmul.f32 %v1575_v3, %v832_v10  ;;  %v1050_v3 = vadd.f32 %v1433_v2, %v1310_v1 }
 0x7e7   : > { %836 = vrot.lane.b32.xlu0 %v834_v11, %s1599_s25 }
 0x859   : > { %v837_v12 = vpop.permute.xlu0 %836 }
 0x85a   : > { %839 = vst.msk [vmem:[%s1680_s29 + $0x10] sm:$0xff] %vm526_vm3, %v837_v12  ;;  %1421 = vmatmul.mubr.msk.f32.vlgmr.msra.gmra.mrb[0].mxu0 %vm526_vm3, %v837_v12 }
 0x85b   : > { %1510 = vmatpush3.bf16.msra.mxu0 %v1507_v39  ;;  %1469 = vmatprep.mubr.f32.mxu0 %v1063_v6 }
 0x85c   : > { %1512 = vmatprep.subr.bf16.mxu0 %v1511_v41 }
 0x85f   : > { %1514 = vmatpush3.bf16.msra.mxu0 %v1511_v41 }
 0x860   : > { %1516 = vmatprep.subr.bf16.mxu0 %v1515_v44 }
 0x861   : > { %v953_v60 = vld [vmem:[%s1680_s29 + $0x10] sm:$0xff] }
 0x862   : > { %1434 = vmatprep.mubr.msk.f32.mxu1 %vm526_vm3, %v953_v60 }
 0x863   : > { %1518 = vmatpush3.bf16.msra.mxu0 %v1515_v44 }
 0x864   : > { %1520 = vmatprep.subr.bf16.mxu0 %v1519_v47 }
 0x867   : > { %1522 = vmatpush3.bf16.msra.mxu0 %v1519_v47 }
 0x868   : > { %1524 = vmatprep.subr.bf16.mxu0 %v1523_v50 }
 0x86b   : > { %1526 = vmatpush3.bf16.msra.mxu0 %v1523_v50 }
 0x86c   : > { %1528 = vmatprep.subr.bf16.mxu0 %v1527_v53 }
 0x86f   : > { %1530 = vmatpush3.bf16.msra.mxu0 %v1527_v53 }
 0x870   : > { %1532 = vmatprep.subr.bf16.mxu0 %v1531_v56 }
 0x873   : > { %1534 = vmatpush3.bf16.msra.mxu0 %v1531_v56 }
 0x874   : > { %1536 = vmatprep.subr.bf16.mxu0 %v1535_v0 }
 0x877   : > { %1538 = vmatpush3.bf16.msra.mxu0 %v1535_v0 }
 0x92d   : > { %v909_v13 = vpop.f32.mrb[0].mxu0 }
 0x92e   : > { %v913_v14 = vadd.f32 %v909_v13, %v1725_v20  ;;  %v1422_v15 = vpop.f32.mrb[1].mxu0 }
 0x930   : > { %1578 = vtanh.f32 %v913_v14  ;;  %v1309_v17 = vmul.f32 -1.442695, %v913_v14  ;;  %v1315_v14 = vld [vmem:[%s1861_s7] ss:$0 sm:$0xff] }
 0x932   : > { %1580 = vpow2.f32 %v1309_v17 }
 0x93a   : > { %v1579_v16 = vpop.eup %1578 }
 0x93b   : > { %923 = vrot.lane.b32.xlu1 %v1579_v16, %s1598_s24 }
 0x93c   : > { %v1581_v18 = vpop.eup %1580 }
 0x93d   : > { %v917_v19 = vadd.f32 1.0, %v1581_v18 }
 0x93f   : > { %1582 = vrcp.f32 %v917_v19 }
 0x949   : > { %v1583_v21 = vpop.eup %1582 }
 0x94a   : > { %v921_v24 = vmul.f32 %v1583_v21, %v828_v8  ;;  %v1064_v8 = vmax.f32 %v1050_v3, 0.0 }
 0x94c   : > { %1470 = vmatmul.mubr.f32.vlgmr.msra.gmra.mrb[2].mxu0 %v1064_v8 }
 0x9ad   : > { %v924_v22 = vpop.permute.xlu1 %923 }
 0x9ae   : > { %v926_v23 = vmul.f32 %v1583_v21, %v924_v22 }
 0x9b0   : > { %928 = vrot.lane.b32.xlu0 %v926_v23, %s1599_s25 }
 0xa1f   : > { %v1471_v15 = vpop.f32.mrb[2].mxu0 }
 0xa20   : > { %v1162_v16 = vadd.f32 %v1471_v15, %v1315_v14  ;;  %v1156_v17 = vpop.f32.mrb[3].mxu0 }
 0xa21   : > { %v1157_v18 = vadd.f32 %v1315_v14, %v1156_v17 }
 0xa22   : > { %v929_v25 = vpop.permute.xlu0 %928  ;;  %v1176_v22 = vmax.f32 %v1162_v16, 0.0 }
 0xa23   : > { %v931_v26 = vadd.f32 %v929_v25, %v921_v24  ;;  %v1175_v19 = vmax.f32 %v1157_v18, 0.0 }
 0xa24   : > { %1180 = vst [vmem:[%s1675_s26 + $0x8] sm:$0xff] %v1176_v22 }
 0xa25   : > { %1584 = vtanh.f32 %v931_v26  ;;  %1179 = vst [vmem:[%s1675_s26] sm:$0xff] %v1175_v19 }
 0xa2f   : > { %v1585_v20 = vpop.eup %1584 }
 0xa30   : > { %934 = vrot.lane.b32.xlu1 %v1585_v20, %s1598_s24 }
 0xa34   : > { %945 = vrot.lane.b32.xlu1 %v931_v26, %s1600_s27 }
 0xaa2   : > { %v935_v33 = vpop.permute.xlu1 %934 }
 0xaa3   : > { %v937_v34 = vmul.f32 %v1583_v21, %v935_v33 }
 0xaa5   : > { %939 = vrot.lane.b32.xlu0 %v937_v34, %s1599_s25 }
 0xaa6   : > { %v946_v38 = vpop.permute.xlu1 %945 }
 0xaa7   : > { %948 = vst.msk [vmem:[#allocation4] sm:$0xff] %vm526_vm3, %v946_v38  ;;  %950 = vst.msk [vmem:[%s1865_s11] sm:$0xff] %vm526_vm3, %v946_v38 }
 0xb17   : > { %v940_v57 = vpop.permute.xlu0 %939 }
 0xb18   : > { %942 = vst.msk [vmem:[%s1680_s29 + $0x18] sm:$0xff] %vm526_vm3, %v940_v57  ;;  %943 = vst.msk [vmem:[#allocation3] sm:$0xff] %vm526_vm3, %v940_v57 }
 0xb19   : > { %949 = vst.msk [vmem:[%s1864_s10] sm:$0xff] %vm526_vm3, %v940_v57 }
 0xb1f   : > { %v954_v61 = vld [vmem:[%s1680_s29 + $0x18] sm:$0xff] }
 0xb20   : > { %1435 = vmatmul.mubr.msk.f32.gmra.mrb[12].mxu1 %vm526_vm3, %v954_v61 }
 0xbf3   : > { %v1436_v7 = vpop.f32.mrb[12].mxu1 }
 0xbf4   : > { %v1060_v9 = vadd.f32 %v1436_v7, %v1310_v1  ;;  %v1054_v10 = vpop.f32.mrb[13].mxu1 }
 0xbf5   : > { %v1055_v11 = vadd.f32 %v1310_v1, %v1054_v10 }
 0xbf6   : > { %v1066_v13 = vmax.f32 %v1060_v9, 0.0 }
 0xbf7   : > { %v1065_v12 = vmax.f32 %v1055_v11, 0.0 }
 0xbf9   : > { %1472 = vmatprep.mubr.f32.mxu0 %v1065_v12 }
 0xbfa   : > { %1473 = vmatmul.mubr.f32.gmra.mrb[4].mxu0 %v1066_v13 }
 0xccd   : > { %v1474_v21 = vpop.f32.mrb[4].mxu0 }
 0xcce   : > { %v1172_v23 = vadd.f32 %v1474_v21, %v1315_v14  ;;  %v1166_v24 = vpop.f32.mrb[5].mxu0 }
 0xccf   : > { %v1167_v25 = vadd.f32 %v1315_v14, %v1166_v24 }
 0xcd0   : > { %v1178_v20 = vmax.f32 %v1172_v23, 0.0 }
 0xcd1   : > { %v1177_v26 = vmax.f32 %v1167_v25, 0.0 }
 0xcd2   : > { %1182 = vst [vmem:[%s1675_s26 + $0x18] sm:$0xff] %v1178_v20 }
 0xcd3   : > { %1181 = vst [vmem:[%s1675_s26 + $0x10] sm:$0xff] %v1177_v26 }
 0xcd4 PF: > { %s22_s17 = sadd.s32 1, %s1592_s17  }
 0xcd5   : > { %p19_p5 = scmp.ge.s32.totalorder %s22_s17, 4  }
 0xcd7   :  { %21 = sbr.rel (!%p19_p5) target bundleno = 1 (0x1), region = 114 }

</bundles_post_ra>
